<compile_context>
chip_gen: v7x
topology: tpu7x:2x2x1
jax: 0.10.0
libtpu: 0.0.40
codegen_flags: <defaults>
</compile_context>

<pallas_src>
import jax
import jax.numpy as jnp
from jax.experimental import pallas as pl
from jax.experimental.pallas import tpu as pltpu

_COLS = 512  # lane-dense minor dim (multiple of 128)


def _div_kernel(inv_ref, x_ref, o_ref):
    # inv_ref: SMEM (1,) f32 holding 1 / (k / m), precomputed in the wrapper.
    # x_ref / o_ref: (tile_rows, _COLS) VMEM tiles.  One VPU multiply per vreg;
    # the product is downcast once on store (no-op for f32 inputs).
    o_ref[...] = (x_ref[...] * inv_ref[0]).astype(o_ref.dtype)


def _pick_tile_rows_and_vmem():
    """Per-generation max tile rows for (tile_rows, 512) tiles."""
    try:
        kind = jax.devices()[0].device_kind.lower()
    except Exception:
        kind = ""
    if "v7" in kind:
        # 4 MiB per block buffer; in+out double-buffered ~16 MiB -> raise
        # scoped VMEM limit for headroom (physical VMEM is 64 MiB per TC).
        return 2048, 32 * 1024 * 1024
    if "v6" in kind:
        # ~2 MiB per block buffer; ~8 MiB total fits the 32 MiB scoped default.
        return 1024, None
    # v5e and unknown: 1 MiB per block buffer, ~4 MiB total (16 MiB default).
    return 512, None


def div_model(x, k, m):
    """a = k / m; return x / a  (elementwise over x)."""
    # PyTorch promotes integer tensors to float for true division.
    if not jnp.issubdtype(x.dtype, jnp.floating):
        x = x.astype(jnp.float32)
    orig_shape = x.shape
    dtype = x.dtype
    total = x.size

    # Hoisted scalar path: inv = 1 / (k / m), kept in f32 for accuracy.
    a = jnp.asarray(k, dtype=jnp.float32) / jnp.asarray(m, dtype=jnp.float32)
    inv = (jnp.float32(1.0) / a).reshape(1)

    cols = _COLS
    rows = pl.cdiv(total, cols)
    padded_total = rows * cols
    needs_pad = padded_total != total

    # Fast path (needs_pad == False): pure reshape, no extra HBM traffic.
    x_flat = x.reshape(-1)
    if needs_pad:
        x_flat = jnp.pad(x_flat, (0, padded_total - total))
    x2 = x_flat.reshape(rows, cols)

    tile_rows_max, vmem_limit = _pick_tile_rows_and_vmem()
    if rows <= tile_rows_max:
        tile_rows = rows          # single full-extent block (always legal layout)
    else:
        tile_rows = tile_rows_max  # multiple of 8; Pallas masks the partial tail

    grid = (pl.cdiv(rows, tile_rows),)

    itemsize = jnp.dtype(dtype).itemsize
    cost = pl.CostEstimate(
        flops=padded_total,
        bytes_accessed=2 * padded_total * itemsize,
        transcendentals=0,
    )

    compiler_params = pltpu.CompilerParams(
        dimension_semantics=("parallel",),
        vmem_limit_bytes=vmem_limit,
    )

    # Only alias when the padded slab was actually materialized; aliasing a
    # plain reshape of an un-donated jit parameter forces a defensive copy.
    io_aliases = {1: 0} if needs_pad else {}

    out2 = pl.pallas_call(
        _div_kernel,
        out_shape=jax.ShapeDtypeStruct((rows, cols), dtype),
        grid=grid,
        in_specs=[
            pl.BlockSpec(memory_space=pltpu.MemorySpace.SMEM),  # inv scalar
            pl.BlockSpec((tile_rows, cols), lambda i: (i, 0)),  # x tile
        ],
        out_specs=pl.BlockSpec((tile_rows, cols), lambda i: (i, 0)),
        compiler_params=compiler_params,
        cost_estimate=cost,
        input_output_aliases=io_aliases,
    )(inv, x2)

    out_flat = out2.reshape(-1)
    if needs_pad:
        out_flat = out_flat[:total]
    return out_flat.reshape(orig_shape)


if __name__ == "__main__":
    key = jax.random.PRNGKey(0)

    # Small shapes consistent with the module (elementwise over any tensor).
    x = jax.random.normal(key, (2, 4, 16, 16), dtype=jnp.float32)
    k = jnp.float32(9.0)
    m = jnp.float32(3.0)

    div_jit = jax.jit(div_model)
    out = div_jit(x, k, m)
    out = jax.block_until_ready(out)

    # Reference check against the PyTorch forward semantics.
    # (Kernel multiplies by 1/(k/m); tolerance absorbs the 1-ulp difference.)
    ref = x / (k / m)
    assert out.shape == x.shape and out.dtype == x.dtype
    assert jnp.allclose(out, ref, rtol=1e-6, atol=1e-6)

    print("KERNEL_OK")
</pallas_src>

<mosaic_0001>
module attributes {stable_mosaic.version = 11 : i64} {
  func.func @_div_kernel(%arg0: i32, %arg1: memref<1xf32, #tpu.memory_space<smem>>, %arg2: memref<4x512xf32, #tpu.memory_space<vmem>>, %arg3: memref<4x512xf32, #tpu.memory_space<vmem>>) attributes {dimension_semantics = [#tpu.dimension_semantics<parallel>], iteration_bounds = array<i64: 1>, scalar_prefetch = 0 : i64, scratch_operands = 0 : i64, tpu.core_type = #tpu.core_type<tc>, window_params = [{transform_indices = @transform_0, window_bounds = array<i64: 1>}, {transform_indices = @transform_1, window_bounds = array<i64: 4, 512>}, {transform_indices = @transform_2, window_bounds = array<i64: 4, 512>}]} {
    %c0 = arith.constant 0 : index
    %c0_0 = arith.constant 0 : index
    %0 = vector.load %arg2[%c0, %c0_0] : memref<4x512xf32, #tpu.memory_space<vmem>>, vector<4x512xf32>
    %c0_1 = arith.constant 0 : index
    %1 = memref.load %arg1[%c0_1] : memref<1xf32, #tpu.memory_space<smem>>
    %2 = vector.broadcast %1 : f32 to vector<4x512xf32>
    %3 = arith.mulf %0, %2 : vector<4x512xf32>
    %c0_2 = arith.constant 0 : index
    %c0_3 = arith.constant 0 : index
    %4 = vector.load %arg3[%c0_2, %c0_3] : memref<4x512xf32, #tpu.memory_space<vmem>>, vector<4x512xf32>
    tpu.vector_store %arg3[%c0_2, %c0_3], %3 {strides = array<i32>} : memref<4x512xf32, #tpu.memory_space<vmem>>, vector<4x512xf32>,
    return
  }
  func.func @transform_0(%arg0: i32) -> i32 {
    %c0_i32 = arith.constant 0 : i32
    %c0_i32_0 = arith.constant 0 : i32
    return %c0_i32 : i32
  }
  func.func @transform_1(%arg0: i32) -> (i32, i32) {
    %c0_i32 = arith.constant 0 : i32
    %c0_i32_0 = arith.constant 0 : i32
    return %arg0, %c0_i32 : i32, i32
  }
  func.func @transform_2(%arg0: i32) -> (i32, i32) {
    %c0_i32 = arith.constant 0 : i32
    %c0_i32_0 = arith.constant 0 : i32
    return %arg0, %c0_i32 : i32, i32
  }
}

</mosaic_0001>

<bundles_post_ra>
// kernel: div_model.1
= control target key start
LH: loop header
LB: loop body
LE: loop exit
PB: predicated region body
PF: predicated region fallthrough
CT: control target
= control target key end

     0   :  { %s54_s0 = inlined_call_operand.<no memory space> [shape: f32[1], index: 0, kind: input, shape index: {}]   ;;  %s55_s1 = inlined_call_operand.vmem [shape: f32[4,512], index: 1, kind: input, shape index: {}]   ;;  %s56_s2 = inlined_call_operand.vmem [shape: f32[4,512], index: 2, kind: output, shape index: {}]  }
   0x1   :  { %v12_v0 = vld [vmem:[%s55_s1] sm:$0xff]  ;;  %v15_v1 = vstv %s54_s0  ;;  %v13_v2 = vld [vmem:[%s55_s1 + $0x8] sm:$0xff] }
   0x2   :  { %v16_v3 = vmul.f32 %v15_v1, %v12_v0  ;;  %v17_v4 = vmul.f32 %v15_v1, %v13_v2 }
   0x4   :  { %18 = vst [vmem:[%s56_s2] sm:$0xff] %v16_v3  ;;  %19 = vst [vmem:[%s56_s2 + $0x8] sm:$0xff] %v17_v4 }

</bundles_post_ra>
